<compile_context>
chip_gen: v7x
topology: tpu7x:2x2x1
jax: 0.10.0
libtpu: 0.0.40
codegen_flags: <defaults>
</compile_context>

<pallas_src>
import jax
import jax.numpy as jnp
from jax import lax
from jax.experimental import pallas as pl
from jax.experimental.pallas import tpu as pltpu

EPS = 1e-5
K = 5      # ResBlockDP default kernel size
PAD = 2    # ResBlockDP default padding (same-length conv)


def _resblock_kernel(x_ref, halo_ref, w1_ref, b1_ref, w2_ref, b2_ref,
                     w3_ref, b3_ref, o_ref):
    l = pl.program_id(1)
    nl = pl.num_programs(1)

    x = x_ref[0]                                    # (C1, Lt)  bf16
    lt = x.shape[1]

    # --- cv1: 1x1 conv (BN folded) + ReLU, on the tile and its 4 halo columns.
    def cv1(inp):
        h = jnp.dot(w1_ref[...], inp, preferred_element_type=jnp.float32)
        return jnp.maximum(h + b1_ref[...], 0.0)

    h_c = cv1(x)                                    # (C_, Lt) f32
    h_h = cv1(halo_ref[0, 0])                       # (C_, 4)  f32

    # Conv zero padding: halo columns falling outside [0, L) must be 0 after cv1.
    col = lax.broadcasted_iota(jnp.int32, h_h.shape, 1)
    keep = jnp.logical_and(jnp.logical_or(l > 0, col >= PAD),
                           jnp.logical_or(l < nl - 1, col < PAD))
    h_h = jnp.where(keep, h_h, 0.0)

    # Assemble the haloed activation (lane-axis concat), cast to bf16 for the MXU.
    h_ext = jnp.concatenate([h_h[:, :PAD], h_c, h_h[:, PAD:]],
                            axis=1).astype(jnp.bfloat16)      # (C_, Lt + 4)

    # --- cv2: k=5, p=2 conv as 5 shifted matmuls, accumulated sequentially.
    y = jnp.dot(w2_ref[0], h_ext[:, 0:lt], preferred_element_type=jnp.float32)
    for t in range(1, K):
        y = y + jnp.dot(w2_ref[t], h_ext[:, t:t + lt],
                        preferred_element_type=jnp.float32)
    y = jnp.maximum(y + b2_ref[...], 0.0)           # (C_, Lt) f32

    # --- cv3: 1x1 conv (BN folded) + ReLU.
    z = jnp.dot(w3_ref[...], y.astype(jnp.bfloat16),
                preferred_element_type=jnp.float32)
    z = jnp.maximum(z + b3_ref[...], 0.0)           # (C1, Lt) f32

    # --- residual add in f32.
    o_ref[0] = (z + x.astype(jnp.float32)).astype(o_ref.dtype)


def _fold_bn(w, b, gamma, beta, mu, var, eps=EPS):
    """Fold eval-mode BatchNorm into conv weight/bias. w: (Cout, Cin, K)."""
    s = gamma / jnp.sqrt(var + eps)                 # (Cout,)
    return w * s[:, None, None], (b - mu) * s + beta


def _pick_l_tile(L, max_tile=512):
    # Biggest 128-multiple tile <= max_tile that divides L; else the whole axis.
    # (Keep tiles modest so double-buffered input+output fit v7x's 64 MiB VMEM.)
    if L <= max_tile:
        return L
    for t in range(max_tile - (max_tile % 128), 127, -128):
        if t > 0 and L % t == 0:
            return t
    return L


def resblockdp_pallas(x_ncl, p, *, l_tile=None, out_dtype=jnp.float32):
    """x_ncl: (N, C1, L) PyTorch layout. Returns (N, C1, L)."""
    N, C1, L = x_ncl.shape

    w1, b1 = _fold_bn(p["w1"], p["b1"], p["g1"], p["be1"], p["m1"], p["v1"])
    w2, b2 = _fold_bn(p["w2"], p["b2"], p["g2"], p["be2"], p["m2"], p["v2"])
    w3, b3 = _fold_bn(p["w3"], p["b3"], p["g3"], p["be3"], p["m3"], p["v3"])
    c_ = w1.shape[0]

    w1m = w1[:, :, 0].astype(jnp.bfloat16)                    # (C_, C1)
    w2s = jnp.transpose(w2, (2, 0, 1)).astype(jnp.bfloat16)   # (K, C_out, C_in)
    w3m = w3[:, :, 0].astype(jnp.bfloat16)                    # (C1, C_)
    b1c = b1.reshape(c_, 1).astype(jnp.float32)
    b2c = b2.reshape(c_, 1).astype(jnp.float32)
    b3c = b3.reshape(C1, 1).astype(jnp.float32)

    lt = l_tile if l_tile is not None else _pick_l_tile(L)
    assert L % lt == 0, "L tile must divide L"
    n_lt = L // lt

    x_bf = x_ncl.astype(jnp.bfloat16)                          # NCL, no transpose

    # Per-tile halo columns of x (global positions l*lt-2, l*lt-1, l*lt+lt, +lt+1).
    xp = jnp.pad(x_bf, ((0, 0), (0, 0), (PAD, PAD)))           # (N, C1, L + 4)
    offs = jnp.concatenate([jnp.arange(PAD), lt + PAD + jnp.arange(PAD)])
    cols = (jnp.arange(n_lt) * lt)[:, None] + offs[None, :]    # (n_lt, 4)
    halo = jnp.take(xp, cols.reshape(-1), axis=2)              # (N, C1, n_lt*4)
    halo = halo.reshape(N, C1, n_lt, 2 * PAD).transpose(0, 2, 1, 3)  # (N,n_lt,C1,4)

    out = pl.pallas_call(
        _resblock_kernel,
        out_shape=jax.ShapeDtypeStruct((N, C1, L), out_dtype),
        grid_spec=pltpu.PrefetchScalarGridSpec(
            num_scalar_prefetch=0,
            grid=(N, n_lt),
            in_specs=[
                pl.BlockSpec((1, C1, lt), lambda n, l: (n, 0, l)),
                pl.BlockSpec((1, 1, C1, 2 * PAD), lambda n, l: (n, l, 0, 0)),
                pl.BlockSpec((c_, C1), lambda n, l: (0, 0)),
                pl.BlockSpec((c_, 1), lambda n, l: (0, 0)),
                pl.BlockSpec((K, c_, c_), lambda n, l: (0, 0, 0)),
                pl.BlockSpec((c_, 1), lambda n, l: (0, 0)),
                pl.BlockSpec((C1, c_), lambda n, l: (0, 0)),
                pl.BlockSpec((C1, 1), lambda n, l: (0, 0)),
            ],
            out_specs=pl.BlockSpec((1, C1, lt), lambda n, l: (n, 0, l)),
        ),
        compiler_params=pltpu.CompilerParams(
            dimension_semantics=("parallel", "parallel")),
    )(x_bf, halo, w1m, b1c, w2s, b2c, w3m, b3c)
    return out


def resblockdp_ref(x, p):
    """Pure-JAX reference matching the PyTorch module (eval mode)."""
    def cna(z, w, b, g, be, mu, var, pad):
        y = lax.conv_general_dilated(
            z, w, window_strides=(1,), padding=[(pad, pad)],
            dimension_numbers=("NCH", "OIH", "NCH"))
        y = y + b[None, :, None]
        y = (y - mu[None, :, None]) / jnp.sqrt(var[None, :, None] + EPS)
        y = y * g[None, :, None] + be[None, :, None]
        return jnp.maximum(y, 0.0)                  # ReLU (module default act)

    h = cna(x, p["w1"], p["b1"], p["g1"], p["be1"], p["m1"], p["v1"], 0)
    h = cna(h, p["w2"], p["b2"], p["g2"], p["be2"], p["m2"], p["v2"], PAD)
    h = cna(h, p["w3"], p["b3"], p["g3"], p["be3"], p["m3"], p["v3"], 0)
    return h + x                                    # Dropout1d is identity in eval


def make_params(key, c1, k=K):
    c_ = c1 // 2
    ks = jax.random.split(key, 18)
    return {
        "w1": 0.2 * jax.random.normal(ks[0], (c_, c1, 1), jnp.float32),
        "b1": 0.1 * jax.random.normal(ks[1], (c_,), jnp.float32),
        "g1": jax.random.uniform(ks[2], (c_,), jnp.float32, 0.5, 1.5),
        "be1": 0.1 * jax.random.normal(ks[3], (c_,), jnp.float32),
        "m1": 0.1 * jax.random.normal(ks[4], (c_,), jnp.float32),
        "v1": jax.random.uniform(ks[5], (c_,), jnp.float32, 0.5, 1.5),
        "w2": 0.2 * jax.random.normal(ks[6], (c_, c_, k), jnp.float32),
        "b2": 0.1 * jax.random.normal(ks[7], (c_,), jnp.float32),
        "g2": jax.random.uniform(ks[8], (c_,), jnp.float32, 0.5, 1.5),
        "be2": 0.1 * jax.random.normal(ks[9], (c_,), jnp.float32),
        "m2": 0.1 * jax.random.normal(ks[10], (c_,), jnp.float32),
        "v2": jax.random.uniform(ks[11], (c_,), jnp.float32, 0.5, 1.5),
        "w3": 0.2 * jax.random.normal(ks[12], (c1, c_, 1), jnp.float32),
        "b3": 0.1 * jax.random.normal(ks[13], (c1,), jnp.float32),
        "g3": jax.random.uniform(ks[14], (c1,), jnp.float32, 0.5, 1.5),
        "be3": 0.1 * jax.random.normal(ks[15], (c1,), jnp.float32),
        "m3": 0.1 * jax.random.normal(ks[16], (c1,), jnp.float32),
        "v3": jax.random.uniform(ks[17], (c1,), jnp.float32, 0.5, 1.5),
    }


if __name__ == "__main__":
    key = jax.random.PRNGKey(0)
    kx, kx2, kp = jax.random.split(key, 3)

    N, C1 = 2, 16
    params = make_params(kp, C1)

    # Case 1: small shapes (single L tile).
    x = jax.random.normal(kx, (N, C1, 16), jnp.float32)        # PyTorch NCL input
    out = jax.block_until_ready(resblockdp_pallas(x, params))
    ref = resblockdp_ref(x, params)
    assert out.shape == x.shape
    # bf16 MXU operands -> tolerance loosened (review-sanctioned) vs the f32 reference.
    assert jnp.allclose(out, ref, atol=5e-2, rtol=5e-2), "mismatch vs reference (case 1)"

    # Case 2: L=256 split into two 128-wide tiles -> exercises the k=5 halo path.
    x2 = jax.random.normal(kx2, (N, C1, 256), jnp.float32)
    out2 = jax.block_until_ready(resblockdp_pallas(x2, params, l_tile=128))
    ref2 = resblockdp_ref(x2, params)
    assert jnp.allclose(out2, ref2, atol=5e-2, rtol=5e-2), "mismatch vs reference (case 2)"

    print("KERNEL_OK")
</pallas_src>

<mosaic_0001>
module attributes {stable_mosaic.version = 11 : i64} {
  func.func @_resblock_kernel(%arg0: i32, %arg1: i32, %arg2: memref<1x16x16xbf16, #tpu.memory_space<vmem>>, %arg3: memref<1x1x16x4xbf16, #tpu.memory_space<vmem>>, %arg4: memref<8x16xbf16, #tpu.memory_space<vmem>>, %arg5: memref<8x1xf32, #tpu.memory_space<vmem>>, %arg6: memref<5x8x8xbf16, #tpu.memory_space<vmem>>, %arg7: memref<8x1xf32, #tpu.memory_space<vmem>>, %arg8: memref<16x8xbf16, #tpu.memory_space<vmem>>, %arg9: memref<16x1xf32, #tpu.memory_space<vmem>>, %arg10: memref<1x16x16xf32, #tpu.memory_space<vmem>>) attributes {dimension_semantics = [#tpu.dimension_semantics<parallel>, #tpu.dimension_semantics<parallel>], iteration_bounds = array<i64: 2, 1>, scalar_prefetch = 0 : i64, scratch_operands = 0 : i64, tpu.core_type = #tpu.core_type<tc>, window_params = [{transform_indices = @transform_0, window_bounds = array<i64: 1, 16, 16>}, {transform_indices = @transform_1, window_bounds = array<i64: 1, 1, 16, 4>}, {pipeline_mode = #tpu.pipeline_mode<synchronous>, transform_indices = @transform_2, window_bounds = array<i64: 8, 16>}, {pipeline_mode = #tpu.pipeline_mode<synchronous>, transform_indices = @transform_3, window_bounds = array<i64: 8, 1>}, {pipeline_mode = #tpu.pipeline_mode<synchronous>, transform_indices = @transform_4, window_bounds = array<i64: 5, 8, 8>}, {pipeline_mode = #tpu.pipeline_mode<synchronous>, transform_indices = @transform_5, window_bounds = array<i64: 8, 1>}, {pipeline_mode = #tpu.pipeline_mode<synchronous>, transform_indices = @transform_6, window_bounds = array<i64: 16, 8>}, {pipeline_mode = #tpu.pipeline_mode<synchronous>, transform_indices = @transform_7, window_bounds = array<i64: 16, 1>}, {transform_indices = @transform_8, window_bounds = array<i64: 1, 16, 16>}]} {
    %c0 = arith.constant 0 : index
    %c0_0 = arith.constant 0 : index
    %c0_1 = arith.constant 0 : index
    %0 = vector.load %arg2[%c0, %c0_0, %c0_1] : memref<1x16x16xbf16, #tpu.memory_space<vmem>>, vector<1x16x16xbf16>
    %1 = vector.shape_cast %0 : vector<1x16x16xbf16> to vector<16x16xbf16>
    %c0_2 = arith.constant 0 : index
    %c0_3 = arith.constant 0 : index
    %2 = vector.load %arg4[%c0_2, %c0_3] : memref<8x16xbf16, #tpu.memory_space<vmem>>, vector<8x16xbf16>
    %cst = arith.constant dense<0.000000e+00> : vector<8x16xf32>
    %3 = tpu.matmul %2, %1, %cst {dimension_numbers = #tpu.dot_dimension_numbers<[1], [0], [0], [1], [0, 0, 1, 1], [], []>} : vector<8x16xbf16>, vector<16x16xbf16>, vector<8x16xf32> -> vector<8x16xf32>
    %c0_4 = arith.constant 0 : index
    %c0_5 = arith.constant 0 : index
    %4 = vector.load %arg5[%c0_4, %c0_5] : memref<8x1xf32, #tpu.memory_space<vmem>>, vector<8x1xf32>
    %5 = vector.broadcast %4 : vector<8x1xf32> to vector<8x16xf32>
    %6 = arith.addf %3, %5 : vector<8x16xf32>
    %cst_6 = arith.constant 0.000000e+00 : f32
    %7 = vector.broadcast %cst_6 : f32 to vector<8x16xf32>
    %8 = arith.maximumf %6, %7 : vector<8x16xf32>
    %c0_7 = arith.constant 0 : index
    %c0_8 = arith.constant 0 : index
    %c0_9 = arith.constant 0 : index
    %c0_10 = arith.constant 0 : index
    %9 = vector.load %arg3[%c0_7, %c0_8, %c0_9, %c0_10] : memref<1x1x16x4xbf16, #tpu.memory_space<vmem>>, vector<1x1x16x4xbf16>
    %10 = vector.shape_cast %9 : vector<1x1x16x4xbf16> to vector<16x4xbf16>
    %c0_11 = arith.constant 0 : index
    %c0_12 = arith.constant 0 : index
    %11 = vector.load %arg4[%c0_11, %c0_12] : memref<8x16xbf16, #tpu.memory_space<vmem>>, vector<8x16xbf16>
    %cst_13 = arith.constant dense<0.000000e+00> : vector<8x4xf32>
    %12 = tpu.matmul %11, %10, %cst_13 {dimension_numbers = #tpu.dot_dimension_numbers<[1], [0], [0], [1], [0, 0, 1, 1], [], []>} : vector<8x16xbf16>, vector<16x4xbf16>, vector<8x4xf32> -> vector<8x4xf32>
    %c0_14 = arith.constant 0 : index
    %c0_15 = arith.constant 0 : index
    %13 = vector.load %arg5[%c0_14, %c0_15] : memref<8x1xf32, #tpu.memory_space<vmem>>, vector<8x1xf32>
    %14 = vector.broadcast %13 : vector<8x1xf32> to vector<8x4xf32>
    %15 = arith.addf %12, %14 : vector<8x4xf32>
    %cst_16 = arith.constant 0.000000e+00 : f32
    %16 = vector.broadcast %cst_16 : f32 to vector<8x4xf32>
    %17 = arith.maximumf %15, %16 : vector<8x4xf32>
    %18 = tpu.iota {dimensions = array<i32: 1>} : vector<8x4xi32>
    %c0_i32 = arith.constant 0 : i32
    %19 = arith.cmpi sgt, %arg1, %c0_i32 : i32
    %c2_i32 = arith.constant 2 : i32
    %20 = vector.broadcast %c2_i32 : i32 to vector<8x4xi32>
    %21 = arith.cmpi sge, %18, %20 : vector<8x4xi32>
    %22 = vector.broadcast %19 : i1 to vector<8x4xi1>
    %23 = arith.ori %22, %21 : vector<8x4xi1>
    %c0_i32_17 = arith.constant 0 : i32
    %24 = arith.cmpi slt, %arg1, %c0_i32_17 : i32
    %c2_i32_18 = arith.constant 2 : i32
    %25 = vector.broadcast %c2_i32_18 : i32 to vector<8x4xi32>
    %26 = arith.cmpi slt, %18, %25 : vector<8x4xi32>
    %27 = vector.broadcast %24 : i1 to vector<8x4xi1>
    %28 = arith.ori %27, %26 : vector<8x4xi1>
    %29 = arith.andi %23, %28 : vector<8x4xi1>
    %cst_19 = arith.constant 0.000000e+00 : f32
    %30 = vector.broadcast %cst_19 : f32 to vector<8x4xf32>
    %31 = arith.select %29, %17, %30 : vector<8x4xi1>, vector<8x4xf32>
    %32 = vector.extract_strided_slice %31 {offsets = [0, 0], sizes = [8, 2], strides = [1, 1]} : vector<8x4xf32> to vector<8x2xf32>
    %33 = vector.extract_strided_slice %31 {offsets = [0, 2], sizes = [8, 2], strides = [1, 1]} : vector<8x4xf32> to vector<8x2xf32>
    %34 = tpu.concatenate %32, %8, %33 in 1 : vector<8x2xf32>, vector<8x16xf32>, vector<8x2xf32> -> vector<8x20xf32>
    %35 = arith.truncf %34 : vector<8x20xf32> to vector<8x20xbf16>
    %c0_20 = arith.constant 0 : index
    %c0_21 = arith.constant 0 : index
    %c0_22 = arith.constant 0 : index
    %36 = vector.load %arg6[%c0_20, %c0_21, %c0_22] : memref<5x8x8xbf16, #tpu.memory_space<vmem>>, vector<1x8x8xbf16>
    %37 = vector.shape_cast %36 : vector<1x8x8xbf16> to vector<8x8xbf16>
    %38 = vector.extract_strided_slice %35 {offsets = [0, 0], sizes = [8, 16], strides = [1, 1]} : vector<8x20xbf16> to vector<8x16xbf16>
    %cst_23 = arith.constant dense<0.000000e+00> : vector<8x16xf32>
    %39 = tpu.matmul %37, %38, %cst_23 {dimension_numbers = #tpu.dot_dimension_numbers<[1], [0], [0], [1], [0, 0, 1, 1], [], []>} : vector<8x8xbf16>, vector<8x16xbf16>, vector<8x16xf32> -> vector<8x16xf32>
    %c1 = arith.constant 1 : index
    %c0_24 = arith.constant 0 : index
    %c0_25 = arith.constant 0 : index
    %40 = vector.load %arg6[%c1, %c0_24, %c0_25] : memref<5x8x8xbf16, #tpu.memory_space<vmem>>, vector<1x8x8xbf16>
    %41 = vector.shape_cast %40 : vector<1x8x8xbf16> to vector<8x8xbf16>
    %42 = vector.extract_strided_slice %35 {offsets = [0, 1], sizes = [8, 16], strides = [1, 1]} : vector<8x20xbf16> to vector<8x16xbf16>
    %cst_26 = arith.constant dense<0.000000e+00> : vector<8x16xf32>
    %43 = tpu.matmul %41, %42, %cst_26 {dimension_numbers = #tpu.dot_dimension_numbers<[1], [0], [0], [1], [0, 0, 1, 1], [], []>} : vector<8x8xbf16>, vector<8x16xbf16>, vector<8x16xf32> -> vector<8x16xf32>
    %44 = arith.addf %39, %43 : vector<8x16xf32>
    %c2 = arith.constant 2 : index
    %c0_27 = arith.constant 0 : index
    %c0_28 = arith.constant 0 : index
    %45 = vector.load %arg6[%c2, %c0_27, %c0_28] : memref<5x8x8xbf16, #tpu.memory_space<vmem>>, vector<1x8x8xbf16>
    %46 = vector.shape_cast %45 : vector<1x8x8xbf16> to vector<8x8xbf16>
    %47 = vector.extract_strided_slice %35 {offsets = [0, 2], sizes = [8, 16], strides = [1, 1]} : vector<8x20xbf16> to vector<8x16xbf16>
    %cst_29 = arith.constant dense<0.000000e+00> : vector<8x16xf32>
    %48 = tpu.matmul %46, %47, %cst_29 {dimension_numbers = #tpu.dot_dimension_numbers<[1], [0], [0], [1], [0, 0, 1, 1], [], []>} : vector<8x8xbf16>, vector<8x16xbf16>, vector<8x16xf32> -> vector<8x16xf32>
    %49 = arith.addf %44, %48 : vector<8x16xf32>
    %c3 = arith.constant 3 : index
    %c0_30 = arith.constant 0 : index
    %c0_31 = arith.constant 0 : index
    %50 = vector.load %arg6[%c3, %c0_30, %c0_31] : memref<5x8x8xbf16, #tpu.memory_space<vmem>>, vector<1x8x8xbf16>
    %51 = vector.shape_cast %50 : vector<1x8x8xbf16> to vector<8x8xbf16>
    %52 = vector.extract_strided_slice %35 {offsets = [0, 3], sizes = [8, 16], strides = [1, 1]} : vector<8x20xbf16> to vector<8x16xbf16>
    %cst_32 = arith.constant dense<0.000000e+00> : vector<8x16xf32>
    %53 = tpu.matmul %51, %52, %cst_32 {dimension_numbers = #tpu.dot_dimension_numbers<[1], [0], [0], [1], [0, 0, 1, 1], [], []>} : vector<8x8xbf16>, vector<8x16xbf16>, vector<8x16xf32> -> vector<8x16xf32>
    %54 = arith.addf %49, %53 : vector<8x16xf32>
    %c4 = arith.constant 4 : index
    %c0_33 = arith.constant 0 : index
    %c0_34 = arith.constant 0 : index
    %55 = vector.load %arg6[%c4, %c0_33, %c0_34] : memref<5x8x8xbf16, #tpu.memory_space<vmem>>, vector<1x8x8xbf16>
    %56 = vector.shape_cast %55 : vector<1x8x8xbf16> to vector<8x8xbf16>
    %57 = vector.extract_strided_slice %35 {offsets = [0, 4], sizes = [8, 16], strides = [1, 1]} : vector<8x20xbf16> to vector<8x16xbf16>
    %cst_35 = arith.constant dense<0.000000e+00> : vector<8x16xf32>
    %58 = tpu.matmul %56, %57, %cst_35 {dimension_numbers = #tpu.dot_dimension_numbers<[1], [0], [0], [1], [0, 0, 1, 1], [], []>} : vector<8x8xbf16>, vector<8x16xbf16>, vector<8x16xf32> -> vector<8x16xf32>
    %59 = arith.addf %54, %58 : vector<8x16xf32>
    %c0_36 = arith.constant 0 : index
    %c0_37 = arith.constant 0 : index
    %60 = vector.load %arg7[%c0_36, %c0_37] : memref<8x1xf32, #tpu.memory_space<vmem>>, vector<8x1xf32>
    %61 = vector.broadcast %60 : vector<8x1xf32> to vector<8x16xf32>
    %62 = arith.addf %59, %61 : vector<8x16xf32>
    %cst_38 = arith.constant 0.000000e+00 : f32
    %63 = vector.broadcast %cst_38 : f32 to vector<8x16xf32>
    %64 = arith.maximumf %62, %63 : vector<8x16xf32>
    %c0_39 = arith.constant 0 : index
    %c0_40 = arith.constant 0 : index
    %65 = vector.load %arg8[%c0_39, %c0_40] : memref<16x8xbf16, #tpu.memory_space<vmem>>, vector<16x8xbf16>
    %66 = arith.truncf %64 : vector<8x16xf32> to vector<8x16xbf16>
    %cst_41 = arith.constant dense<0.000000e+00> : vector<16x16xf32>
    %67 = tpu.matmul %65, %66, %cst_41 {dimension_numbers = #tpu.dot_dimension_numbers<[1], [0], [0], [1], [0, 0, 1, 1], [], []>} : vector<16x8xbf16>, vector<8x16xbf16>, vector<16x16xf32> -> vector<16x16xf32>
    %c0_42 = arith.constant 0 : index
    %c0_43 = arith.constant 0 : index
    %68 = vector.load %arg9[%c0_42, %c0_43] : memref<16x1xf32, #tpu.memory_space<vmem>>, vector<16x1xf32>
    %69 = vector.broadcast %68 : vector<16x1xf32> to vector<16x16xf32>
    %70 = arith.addf %67, %69 : vector<16x16xf32>
    %cst_44 = arith.constant 0.000000e+00 : f32
    %71 = vector.broadcast %cst_44 : f32 to vector<16x16xf32>
    %72 = arith.maximumf %70, %71 : vector<16x16xf32>
    %73 = arith.extf %1 : vector<16x16xbf16> to vector<16x16xf32>
    %74 = arith.addf %72, %73 : vector<16x16xf32>
    %c0_45 = arith.constant 0 : index
    %c0_46 = arith.constant 0 : index
    %c0_47 = arith.constant 0 : index
    %75 = vector.load %arg10[%c0_45, %c0_46, %c0_47] : memref<1x16x16xf32, #tpu.memory_space<vmem>>, vector<1x16x16xf32>
    %76 = vector.shape_cast %75 : vector<1x16x16xf32> to vector<16x16xf32>
    %77 = vector.shape_cast %74 : vector<16x16xf32> to vector<1x16x16xf32>
    tpu.vector_store %arg10[%c0_45, %c0_46, %c0_47], %77 {strides = array<i32>} : memref<1x16x16xf32, #tpu.memory_space<vmem>>, vector<1x16x16xf32>,
    return
  }
  func.func @transform_0(%arg0: i32, %arg1: i32) -> (i32, i32, i32) {
    %c0_i32 = arith.constant 0 : i32
    %c0_i32_0 = arith.constant 0 : i32
    return %arg0, %c0_i32, %arg1 : i32, i32, i32
  }
  func.func @transform_1(%arg0: i32, %arg1: i32) -> (i32, i32, i32, i32) {
    %c0_i32 = arith.constant 0 : i32
    %c0_i32_0 = arith.constant 0 : i32
    %c0_i32_1 = arith.constant 0 : i32
    return %arg0, %arg1, %c0_i32, %c0_i32_0 : i32, i32, i32, i32
  }
  func.func @transform_2(%arg0: i32, %arg1: i32) -> (i32, i32) {
    %c0_i32 = arith.constant 0 : i32
    %c0_i32_0 = arith.constant 0 : i32
    %c0_i32_1 = arith.constant 0 : i32
    return %c0_i32, %c0_i32_0 : i32, i32
  }
  func.func @transform_3(%arg0: i32, %arg1: i32) -> (i32, i32) {
    %c0_i32 = arith.constant 0 : i32
    %c0_i32_0 = arith.constant 0 : i32
    %c0_i32_1 = arith.constant 0 : i32
    return %c0_i32, %c0_i32_0 : i32, i32
  }
  func.func @transform_4(%arg0: i32, %arg1: i32) -> (i32, i32, i32) {
    %c0_i32 = arith.constant 0 : i32
    %c0_i32_0 = arith.constant 0 : i32
    %c0_i32_1 = arith.constant 0 : i32
    %c0_i32_2 = arith.constant 0 : i32
    return %c0_i32, %c0_i32_0, %c0_i32_1 : i32, i32, i32
  }
  func.func @transform_5(%arg0: i32, %arg1: i32) -> (i32, i32) {
    %c0_i32 = arith.constant 0 : i32
    %c0_i32_0 = arith.constant 0 : i32
    %c0_i32_1 = arith.constant 0 : i32
    return %c0_i32, %c0_i32_0 : i32, i32
  }
  func.func @transform_6(%arg0: i32, %arg1: i32) -> (i32, i32) {
    %c0_i32 = arith.constant 0 : i32
    %c0_i32_0 = arith.constant 0 : i32
    %c0_i32_1 = arith.constant 0 : i32
    return %c0_i32, %c0_i32_0 : i32, i32
  }
  func.func @transform_7(%arg0: i32, %arg1: i32) -> (i32, i32) {
    %c0_i32 = arith.constant 0 : i32
    %c0_i32_0 = arith.constant 0 : i32
    %c0_i32_1 = arith.constant 0 : i32
    return %c0_i32, %c0_i32_0 : i32, i32
  }
  func.func @transform_8(%arg0: i32, %arg1: i32) -> (i32, i32, i32) {
    %c0_i32 = arith.constant 0 : i32
    %c0_i32_0 = arith.constant 0 : i32
    return %arg0, %c0_i32, %arg1 : i32, i32, i32
  }
}

</mosaic_0001>

<bundles_post_ra>
// kernel: tpu_custom_call.1
= control target key start
LH: loop header
LB: loop body
LE: loop exit
PB: predicated region body
PF: predicated region fallthrough
CT: control target
= control target key end

     0   :  { %13 = vsyncpa [#allocation3], 0  ;;  %s1454_s0 = inlined_call_operand.vmem [shape: bf16[2,16,16], index: 0, kind: input, shape index: {}]   ;;  %s1455_s1 = inlined_call_operand.vmem [shape: bf16[2,1,16,4], index: 1, kind: input, shape index: {}]   ;;  %s1456_s2 = inlined_call_operand.vmem [shape: bf16[8,16], index: 2, kind: input, shape index: {}]   ;;  %s1457_s3 = inlined_call_operand.vmem [shape: f32[8,1], index: 3, kind: input, shape index: {}]   ;;  %s1458_s4 = inlined_call_operand.vmem [shape: bf16[5,8,8], index: 4, kind: input, shape index: {}]   ;;  %s1459_s5 = inlined_call_operand.vmem [shape: f32[8,1], index: 5, kind: input, shape index: {}]   ;;  %s1460_s6 = inlined_call_operand.vmem [shape: bf16[16,8], index: 6, kind: input, shape index: {}]   ;;  %s1461_s7 = inlined_call_operand.vmem [shape: f32[16,1], index: 7, kind: input, shape index: {}]   ;;  %s1462_s8 = inlined_call_operand.hbm [shape: f32[2,16,16], index: 8, kind: output, shape index: {}]  }
   0x1   :  { %15 = vsyncpa [#allocation3 + $0x1], 0  ;;  %s1258_s27 = smov 0   ;;  %s1260_s28 = smov 0  }
   0x2   :  { %s1262_s29 = smov 0   ;;  %s1264_s30 = smov 0  }
   0x3   :  { %s1266_s9 = smov 0   ;;  %s1268_s10 = smov 0  }
   0x4 LB: > { %s952_s11 = sadd.s32 4294967295, %s1199_s10   ;;  %s953_s12 = sadd.s32 4294967294, %s1199_s10   ;;  %s1199_s10 = sphi %s1268_s10, %s21_s10   ;;  %s1195_s9 = sphi %s1266_s9, %s1469_s9   ;;  %s1191_s30 = sphi %s1264_s30, %s1468_s30   ;;  %s1187_s29 = sphi %s1262_s29, %s1467_s29   ;;  %s1183_s28 = sphi %s1260_s28, %s1466_s28   ;;  %s1179_s27 = sphi %s1258_s27, %s1465_s27  }
   0x5   : > { %s33_s13 = sadd.s32 1, %s1195_s9  ;;  %s224_s14 = sadd.s32 1, %s1187_s29 }
   0x6   : > { %p35_p0 = scmp.ge.s32.totalorder %s33_s13, 2  ;;  %p234_p1 = scmp.ne.s32.totalorder %s1187_s29, %s1183_s28 }
   0x7   : > { %p235_p2 = scmp.eq.s32.totalorder %s952_s11, 1  ;;  %p240_p3 = scmp.ne.s32.totalorder %s1183_s28, %s1179_s27 }
   0x8   : > { %s1471_s13 = smov (%p35_p0, %s33_s13), 0  ;;  %p241_p5 = scmp.eq.s32.totalorder %s953_s12, 1 }
   0x9   : > { %p1298_p4 = por %p235_p2, %p234_p1  ;;  %s219_s16 = ssub.s32 %s1195_s9, %s1471_s13 }
   0xa   : > { %p956_p6 = scmp.ge.s32.totalorder %s1199_s10, 1  ;;  %p222_p7 = scmp.eq.s32.totalorder %s219_s16, 0 }
   0xb   : > { %p1305_p8 = por %p241_p5, %p240_p3  ;;  %p300_p9 = scmp.lt.s32.totalorder %s1199_s10, 3 }
   0xc   : > { %s1311_s18 = scalar_select %p222_p7, %s1187_s29, %s224_s14  }
   0xd   : > { %p301_p10 = pnand %p956_p6, %p300_p9 }
   0xe   : > { %p346_p11 = scmp.lt.s32.totalorder (!%p301_p10), %s1191_s30, 1  ;;  %v1201_v0 = vmov (!%p301_p10), 0.0   ;;  %v367_v1 = vld [vmem:[%s1457_s3] sm:$0xff] (!%p301_p10)  ;;  %vm1202_vm0 = vmmov (!%p301_p10), 0   ;;  %v1203_v2 = vmov (!%p301_p10), 0   ;;  %vm379_vm1 = vcmask (!%p301_p10), 130048  }
   0xf   : > { %304 = sbr.rel (%p301_p10) target bundleno = 960 (0x3c0), region = 52  ;;  %1001 = vmatprep.subr.bf16.mxu0 (!%p301_p10), %v1201_v0  ;;  %1007 = vmatprep.subr.bf16.mxu1 (!%p301_p10), %v1201_v0  ;;  %v366_v5 = vld [vmem:[%s1456_s2] sm:$0xf] (!%p301_p10)  ;;  %v473_v6 = vlaneseq (!%p301_p10)  ;;  %s1204_s19 = smov (!%p301_p10), 2   ;;  %vm497_vm5 = vcmask (!%p301_p10), 15360   ;;  %vm499_vm6 = vcmask (!%p301_p10), 146432  }
  0x10   : > { %1003 = vmatprep.mubr.msk.bf16.mxu0 (!%p301_p10), %vm1202_vm0, %v1201_v0  ;;  %1009 = vmatprep.mubr.msk.bf16.mxu1 (!%p301_p10), %vm1202_vm0, %v1201_v0  ;;  %s1205_s20 = smov (!%p301_p10), 16   ;;  %vm512_vm7 = vcmask (!%p301_p10), 1043456   ;;  %vm508_vm8 = vcmask (!%p301_p10), 64512   ;;  %v502_v28 = vld [vmem:[%s1458_s4] sm:$0xf] (!%p301_p10)  ;;  %s1209_s26 = smov (!%p301_p10), 125  }
  0x11   : > { %1115 = vset.pattern.permute.xlu0 (!%p301_p10), %v1203_v2  ;;  %1116 = vset.pattern.permute.xlu1 (!%p301_p10), %v1203_v2  ;;  %v474_v7 = vand.u32 (!%p301_p10), 127, %v473_v6  ;;  %v766_v29 = vld [vmem:[%s1461_s7] sm:$0xff] (!%p301_p10)  ;;  %v767_v31 = vld [vmem:[%s1461_s7 + $0x8] sm:$0xff] (!%p301_p10)  ;;  %v973_v43 = vld [vmem:[%s1458_s4 + $0x10] sm:$0xf] (!%p301_p10) }
  0x12   : > { %370 = vperm.xlu0 (!%p301_p10), %1115, %v367_v1   ;;  %v755_v30 = vld [vmem:[%s1459_s5] sm:$0xff] (!%p301_p10)  ;;  %v971_v39 = vld [vmem:[%s1458_s4 + $0xc] sm:$0xf] (!%p301_p10)  ;;  %v969_v41 = vld [vmem:[%s1458_s4 + $0x8] sm:$0xf] (!%p301_p10) }
  0x13   : > { %vm476_vm2 = vcmp.ge.s32.totalorder (!%p301_p10), %v474_v7, 2  ;;  %vm482_vm3 = vcmp.lt.s32.totalorder (!%p301_p10), %v474_v7, 2  ;;  %v966_v35 = vld [vmem:[%s1458_s4 + $0x4] sm:$0xf] (!%p301_p10) }
  0x14   : > { %vm487_vm4 = vmand (!%p301_p10), %vm476_vm2, %vm482_vm3 }
  0x16   : > { %s347_s21 = scalar_select %p346_p11, %s1191_s30, 1 }
  0x18   : > { %s982_s22 = sshll.u32 %s347_s21, 3  ;;  %s1206_s21 = smov 126  }
  0x19   : > { %s353_s25 = scalar_lea.vmem %s1454_s0, %s982_s22  ;;  %s362_s12 = scalar_lea.vmem %s1455_s1, %s982_s22 }
  0x1a   : > { %v1330_v3 = vld [vmem:[%s353_s25] sm:$0xff]   ;;  %s1207_s22 = smov 127   ;;  %s1208_s25 = smov 124  }
  0x1b   : > { %v1118_v4 = vld [vmem:[%s362_s12] sm:$0xff]   ;;  %1002 = vmatpush3.bf16.msra.mxu0 %v1330_v3  ;;  %s1210_s12 = smov [#allocation2]  }
  0x1c   : > { %1008 = vmatpush3.bf16.msra.mxu1 %v1118_v4  ;;  %1013 = vmatprep.subr.bf16.mxu0 %v1201_v0  ;;  %s1125_s14 = sshll.u32 %s1210_s12, 4  ;;  %s1126_s14 = int_to_ptr.vmem [resolvable:$false] %s1125_s14 }
  0x1d   : > { %1019 = vmatprep.subr.bf16.mxu1 %v1201_v0  ;;  %s1127_s16 = scalar_lea.vmem %s1126_s14, 512 }
  0x1e   : > { %1004 = vmatmul.mubr.msk.bf16.vlgmr.msra.gmra.mrb[0].mxu0 %vm379_vm1, %v366_v5 }
  0x1f   : > { %1010 = vmatmul.mubr.msk.bf16.vlgmr.msra.gmra.mrb[0].mxu1 %vm379_vm1, %v366_v5  ;;  %1015 = vmatprep.mubr.msk.bf16.mxu0 %vm1202_vm0, %v1201_v0 }
  0x20   : > { %1021 = vmatprep.mubr.msk.bf16.mxu1 %vm1202_vm0, %v1201_v0 }
  0x91   : > { %v371_v8 = vpop.permute.xlu0 %370 }
  0xf1   : > { %v417_v9 = vpop.f32.mrb[0].mxu0 }
  0xf2   : > { %v466_v10 = vpop.f32.mrb[0].mxu1  ;;  %v418_v11 = vadd.f32 %v417_v9, %v371_v8  ;;  %v1005_v13 = vpop.f32.mrb[1].mxu0 }
  0xf3   : > { %v467_v12 = vadd.f32 %v466_v10, %v371_v8  ;;  %v1011_v14 = vpop.f32.mrb[1].mxu1  ;;  %v420_v15 = vpop.f32.mrb[2].mxu0  ;;  %v1119_v10 = vld [vmem:[%s1460_s6] sm:$0xff]   ;;  %v832_v13 = vunpack.c.l.bf16 %v1330_v3 }
  0xf4   : > { %v469_v16 = vpop.f32.mrb[2].mxu1  ;;  %v423_v17 = vmax.f32 %v418_v11, 0.0  ;;  %v1006_v19 = vpop.f32.mrb[3].mxu0 }
  0xf5   : > { %v472_v18 = vmax.f32 %v467_v12, 0.0  ;;  %v1012_v20 = vpop.f32.mrb[3].mxu1 }
  0xf6   : > { %490 = vrot.lane.b32.xlu0 %v423_v17, %s1204_s19  ;;  %s343_s19 = sand.u32 1, %s1183_s28  }
  0xf7   : > { %v488_v21 = vsel %vm487_vm4, %v472_v18, 0.0  ;;  %v833_v18 = vunpack.c.h.bf16 %v1330_v3 }
  0xf8   : > { %494 = vrot.lane.b32.xlu1 %v488_v21, %s1205_s20  ;;  %s957_s20 = sshll.u32 %s343_s19, 4 }
 0x168   : > { %v491_v22 = vpop.permute.xlu0 %490 }
 0x169   : > { %v498_v23 = vsel %vm497_vm5, %v488_v21, %v491_v22 }
 0x16a   : > { %v495_v24 = vpop.permute.xlu1 %494 }
 0x16b   : > { %v500_v25 = vsel %vm499_vm6, %v498_v23, %v495_v24 }
 0x16c   : > { %v501_v26 = vpack.c.bf16 %v500_v25, %v500_v25 }
 0x16e   : > { %604 = vrot.lane.b32.xlu0 %v501_v26, %s1206_s21  ;;  %506 = vrot.lane.b32.xlu1 %v501_v26, %s1207_s22  ;;  %v560_v27 = vsel %vm512_vm7, %v501_v26, 0  ;;  %s984_s21 = sshll.u32 %s1191_s30, 8  ;;  %s345_s22 = scalar_lea.vmem [#allocation2], %s957_s20 }
 0x16f   : > { %1020 = vmatpush3.bf16.msra.mxu1 %v560_v27  ;;  %s853_s23 = sshll.u32 %s345_s22, 4  ;;  %s1408_s30 = scalar_lea.sflag [#allocation3], %s343_s19  ;;  %s1404_s23 = int_to_ptr.vmem [resolvable:$true] %s853_s23 }
 0x170   : > { %1031 = vmatprep.subr.bf16.mxu1 %v1201_v0  ;;  %s1121_s11 = scalar_lea.vmem %s1404_s23, 256  ;;  %p1128_p1 = scmp.lt.s32.totalorder %s1404_s23, %s1126_s14 }
 0x171   : > { %p1122_p12 = scmp.ne.s32.totalorder %s1404_s23, %s1121_s11  ;;  %p1129_p2 = scmp.lt.s32.totalorder %s1127_s16, %s1121_s11 }
 0x172   : > { %706 = vrot.lane.b32.xlu0 %v501_v26, %s1208_s25  ;;  %655 = vrot.lane.b32.xlu1 %v501_v26, %s1209_s26  ;;  %s1402_s26 = scalar_lea.hbm %s1462_s8, %s984_s21 }
 0x173   : > { %1022 = vmatmul.mubr.msk.bf16.vlgmr.msra.gmra.mrb[4].mxu1 %vm508_vm8, %v502_v28  ;;  %p1123_p13 = pnand %p1122_p12, %p1298_p4  ;;  %p1130_p3 = por %p1129_p2, %p1128_p1 }
 0x174   : > { %1033 = vmatprep.mubr.msk.bf16.mxu1 %vm1202_vm0, %v1201_v0 }
 0x175   : > { %p1124_p0 = pneg %p1123_p13 }
 0x176   : > { %770 = vperm.xlu0 %1115, %v766_v29   ;;  %758 = vperm.xlu1 %1116, %v755_v30  }
 0x177   : > { %p1131_p5 = pnand %p1130_p3, %p1124_p0 }
 0x17a   : > { %775 = vperm.xlu1 %1116, %v767_v31  }
 0x1e0   : > { %v507_v32 = vpop.permute.xlu1 %506  ;;  %v605_v34 = vpop.permute.xlu0 %604 }
 0x1e1   : > { %v514_v33 = vsel %vm512_vm7, %v507_v32, 0  ;;  %v610_v37 = vsel %vm512_vm7, %v605_v34, 0 }
 0x1e2   : > { %1014 = vmatpush3.bf16.msra.mxu0 %v514_v33 }
 0x1e3   : > { %1025 = vmatprep.subr.bf16.mxu0 %v1201_v0 }
 0x1e4   : > { %v656_v36 = vpop.permute.xlu1 %655  ;;  %v707_v40 = vpop.permute.xlu0 %706 }
 0x1e5   : > { %v661_v38 = vsel %vm512_vm7, %v656_v36, 0  ;;  %1016 = vmatmul.mubr.msk.bf16.vlgmr.msra.gmra.mrb[4].mxu0 %vm508_vm8, %v966_v35  ;;  %v712_v42 = vsel %vm512_vm7, %v707_v40, 0 }
 0x1e6   : > { %1026 = vmatpush3.bf16.msra.mxu0 %v610_v37  ;;  %1032 = vmatpush3.bf16.msra.mxu1 %v661_v38 }
 0x1e7   : > { %1027 = vmatprep.mubr.msk.bf16.mxu0 %vm1202_vm0, %v1201_v0  ;;  %1037 = vmatprep.subr.bf16.mxu0 %v1201_v0 }
 0x1e8   : > { %1043 = vmatprep.subr.bf16.mxu1 %v1201_v0 }
 0x1e9   : > { %1034 = vmatmul.mubr.msk.bf16.vlgmr.msra.gmra.mrb[8].mxu1 %vm508_vm8, %v971_v39 }
 0x1ea   : > { %1045 = vmatprep.mubr.msk.bf16.mxu1 %vm1202_vm0, %v1201_v0 }
 0x1ed   : > { %1028 = vmatmul.mubr.msk.bf16.vlgmr.msra.gmra.mrb[8].mxu0 %vm508_vm8, %v969_v41 }
 0x1ee   : > { %1038 = vmatpush3.bf16.msra.mxu0 %v712_v42  ;;  %1039 = vmatprep.mubr.msk.bf16.mxu0 %vm1202_vm0, %v1201_v0 }
 0x1f5   : > { %1040 = vmatmul.mubr.msk.bf16.vlgmr.msra.gmra.mrb[12].mxu0 %vm508_vm8, %v973_v43  ;;  %v759_v2 = vpop.permute.xlu1 %758  ;;  %v771_v11 = vpop.permute.xlu0 %770 }
 0x1f9   : > { %v776_v16 = vpop.permute.xlu1 %775 }
 0x246   : > { %v596_v44 = vpop.f32.mrb[4].mxu1 }
 0x247   : > { %v1023_v45 = vpop.f32.mrb[5].mxu1 }
 0x248   : > { %v599_v46 = vpop.f32.mrb[6].mxu1 }
 0x249   : > { %v1024_v47 = vpop.f32.mrb[7].mxu1 }
 0x2b8   : > { %v550_v48 = vpop.f32.mrb[4].mxu0 }
 0x2b9   : > { %v597_v49 = vadd.f32 %v596_v44, %v550_v48  ;;  %v1017_v50 = vpop.f32.mrb[5].mxu0 }
 0x2ba   : > { %v553_v51 = vpop.f32.mrb[6].mxu0 }
 0x2bb   : > { %v1018_v52 = vpop.f32.mrb[7].mxu0 }
 0x2bc   : > { %v697_v53 = vpop.f32.mrb[8].mxu1 }
 0x2bd   : > { %v1035_v54 = vpop.f32.mrb[9].mxu1 }
 0x2be   : > { %v700_v55 = vpop.f32.mrb[10].mxu1 }
 0x2bf   : > { %v1036_v56 = vpop.f32.mrb[11].mxu1 }
 0x2c0   : > { %v646_v57 = vpop.f32.mrb[8].mxu0 }
 0x2c1   : > { %v652_v58 = vadd.f32 %v646_v57, %v597_v49  ;;  %v1029_v59 = vpop.f32.mrb[9].mxu0 }
 0x2c2   : > { %v649_v60 = vpop.f32.mrb[10].mxu0 }
 0x2c3   : > { %v703_v61 = vadd.f32 %v697_v53, %v652_v58  ;;  %v1030_v62 = vpop.f32.mrb[11].mxu0 }
 0x2c8   : > { %v748_v63 = vpop.f32.mrb[12].mxu0 }
 0x2c9   : > { %v754_v0 = vadd.f32 %v748_v63, %v703_v61  ;;  %v1041_v1 = vpop.f32.mrb[13].mxu0 }
 0x2ca   : > { %v751_v4 = vpop.f32.mrb[14].mxu0 }
 0x2cb   : > { %v761_v5 = vadd.f32 %v759_v2, %v754_v0  ;;  %v1042_v6 = vpop.f32.mrb[15].mxu0 }
 0x2cd   : > { %v762_v7 = vmax.f32 %v761_v5, 0.0 }
 0x2cf   : > { %v765_v8 = vpack.c.bf16 %v762_v7, %v762_v7 }
 0x2d1   : > { %v787_v9 = vsel %vm512_vm7, %v765_v8, 0 }
 0x2d2   : > { %1044 = vmatpush3.bf16.msra.mxu1 %v787_v9 }
 0x2d5   : > { %1046 = vmatmul.mubr.msk.bf16.vlgmr.msra.gmra.mrb[12].mxu1 %vm508_vm8, %v1119_v10 }
 0x3a8   : > { %v823_v12 = vpop.f32.mrb[12].mxu1 }
 0x3a9   : > { %v824_v14 = vadd.f32 %v823_v12, %v771_v11  ;;  %v1047_v15 = vpop.f32.mrb[13].mxu1 }
 0x3aa   : > { %v826_v17 = vpop.f32.mrb[14].mxu1 }
 0x3ab   : > { %v830_v19 = vmax.f32 %v824_v14, 0.0  ;;  %v827_v20 = vadd.f32 %v826_v17, %v776_v16  ;;  %v1048_v21 = vpop.f32.mrb[15].mxu1 }
 0x3ad   : > { %v834_v22 = vadd.f32 %v832_v13, %v830_v19  ;;  %v831_v23 = vmax.f32 %v827_v20, 0.0 }
 0x3af   : > { %836 = vst.msk [vmem:[%s345_s22] sm:$0xff] %vm379_vm1, %v834_v22  ;;  %v835_v3 = vadd.f32 %v833_v18, %v831_v23 }
 0x3b1   : > { %837 = vst.msk [vmem:[%s345_s22 + $0x8] sm:$0xff] %vm379_vm1, %v835_v3 }
 0x3b2   : > { %1134 = shalt.err (!%p1131_p5)
}
 0x3b3   : > { %s1135_s19 = scalar_lea.hbm %s1402_s26, 256  ;;  %s1139_s22 = scalar_lea.hbm %s1462_s8, 512 }
 0x3b4   : > { %p1136_p6 = scmp.ne.s32.totalorder %s1402_s26, %s1135_s19  ;;  %p1140_p10 = scmp.lt.u32.totalorder %s1402_s26, %s1462_s8 }
 0x3b5   : > { %p1141_p11 = scmp.lt.u32.totalorder %s1139_s22, %s1135_s19  ;;  %p1143_p13 = scmp.lt.u32.totalorder %s1135_s19, %s1402_s26 }
 0x3b6   : > { %p1137_p7 = pnand %p1136_p6, %p1298_p4 }
 0x3b7   : > { %p1142_p12 = por %p1141_p11, %p1140_p10 }
 0x3b8   : > { %p1138_p9 = pneg %p1137_p7 }
 0x3b9   : > { %p1144_p0 = por %p1143_p13, %p1142_p12 }
 0x3bb   : > { %p1145_p1 = pnand %p1144_p0, %p1138_p9 }
 0x3bd   : > { %1148 = shalt.err (!%p1145_p1)
}
 0x3be   : > { %s1211_s11 = smov 128   ;;  %s1212_s12 = smov 8  }
 0x3bf   : > { %1049 = dma.vmem_to_hbm [thread:$0]  (%p1298_p4), %s1404_s23, 256, %s1402_s26, %s1408_s30, %s1211_s11, %s1211_s11, %s1212_s12  }
 0x3c0 PF: > { %p1055_p2 = scmp.ge.s32.totalorder %s1199_s10, 2  ;;  %s868_s14 = sand.u32 1, %s1179_s27  }
 0x3c1   : > { %s869_s16 = scalar_lea.sflag [#allocation3], %s868_s14 }
 0x3c2   : > { %p1052_p3 = pnand %p1055_p2, %p1305_p8 }
 0x3c4   : > { %1174 = dma.done.wait (!%p1052_p3), %s869_s16, 256  }
 0x3c5   : > { %1176 = vsyncadd (!%p1052_p3), %s869_s16, 4294967040  ;;  %s21_s10 = sadd.s32 1, %s1199_s10   ;;  %s1465_s27 = smov %s1183_s28 }
 0x3c6   : > { %p18_p5 = scmp.ge.s32.totalorder %s21_s10, 4   ;;  %s1466_s28 = smov %s1187_s29 }
 0x3c7   : > { %s1467_s29 = smov %s1311_s18  ;;  %s1468_s30 = smov %s1195_s9 }
 0x3c8   : > { %s1469_s9 = smov %s1471_s13  ;;  %20 = sbr.rel (!%p18_p5) target bundleno = 4 (0x4), region = 94 }
 0x3cf   :  { %874 = vsyncpa [#allocation3], 1 }
 0x3d0   :  { %876 = vsyncpa [#allocation3 + $0x1], 1 }

</bundles_post_ra>
